<compile_context>
chip_gen: v7x
topology: tpu7x:2x2x1
jax: 0.10.0
libtpu: 0.0.40
codegen_flags: <defaults>
</compile_context>

<pallas_src>
import functools
import math

import jax
import jax.numpy as jnp
from jax.experimental import pallas as pl
from jax.experimental.pallas import tpu as pltpu


# --------------------------------------------------------------------------
# Fused kernel: one grid step == one batch element, everything in VMEM.
# --------------------------------------------------------------------------
def _fused_mha_kernel(xq_ref, xk_ref, xv_ref, w_qkv_ref, b_qkv_ref,
                      w_o_ref, b_o_ref, out_ref, scores_ref,
                      *, heads, d_k, scale, matmul_dtype):
    def mm(a, b):
        # MXU matmul; operands optionally cast to bf16, always f32 accumulate.
        return jnp.dot(a.astype(matmul_dtype), b.astype(matmul_dtype),
                       preferred_element_type=jnp.float32)

    # --- QKV projections (stacked weight tensor, no HBM bounce) -------------
    qp = mm(xq_ref[...], w_qkv_ref[0]) + b_qkv_ref[0]       # (S, D)
    kp = mm(xk_ref[...], w_qkv_ref[1]) + b_qkv_ref[1]       # (S, D)
    vp = mm(xv_ref[...], w_qkv_ref[2]) + b_qkv_ref[2]       # (S, D)

    # Fold 1/sqrt(d_k) into Q once instead of scaling every (S, S) score tile.
    qp = qp * scale

    # --- per-head attention, all heads in this grid step --------------------
    head_outs = []
    for h in range(heads):                                   # static unroll
        lo, hi = h * d_k, (h + 1) * d_k
        q_h = qp[:, lo:hi]                                   # (S, d_k)
        k_h = kp[:, lo:hi]
        v_h = vp[:, lo:hi]

        # scores = q @ k^T  (already scaled via q)
        s = jax.lax.dot_general(
            q_h.astype(matmul_dtype), k_h.astype(matmul_dtype),
            dimension_numbers=(((1,), (1,)), ((), ())),
            preferred_element_type=jnp.float32)              # (S, S) f32

        # numerically-stable softmax, kept in f32
        m = jnp.max(s, axis=-1, keepdims=True)
        p = jnp.exp(s - m)
        denom = jnp.sum(p, axis=-1, keepdims=True)
        p = p * pl.reciprocal(denom, approx=True)            # EUP, not VALU div

        o_h = mm(p, v_h)                                     # (S, d_k) f32
        scores_ref[h] = o_h                                  # per-head output
        head_outs.append(o_h)

    # --- concat heads + output projection (lane-dense (S, D) write) ---------
    concat = jnp.concatenate(head_outs, axis=-1)             # (S, D)
    out_ref[...] = mm(concat, w_o_ref[...]) + b_o_ref[...]   # (S, D)


# --------------------------------------------------------------------------
# Wrapper: layout plumbing + the single pallas_call
# --------------------------------------------------------------------------
def mha_forward(q, k, v, params, heads, matmul_dtype=jnp.float32):
    wq, bq, wk, bk, wv, bv, wo, bo = params
    S, B, D = q.shape
    assert D % heads == 0
    d_k = D // heads
    scale = 1.0 / math.sqrt(d_k)

    # seq-first (S, B, D) -> batch-first (B, S, D) so the kernel grids over B.
    qb = jnp.transpose(q, (1, 0, 2))
    kb = jnp.transpose(k, (1, 0, 2))
    vb = jnp.transpose(v, (1, 0, 2))

    # Pre-transpose weights to (d_in, d_out) and stack QKV into one tensor.
    w_qkv = jnp.stack([wq.T, wk.T, wv.T])                    # (3, D, D)
    b_qkv = jnp.stack([bq, bk, bv]).reshape(3, 1, D)         # (3, 1, D)
    w_o_t = wo.T                                             # (D, D)
    b_o = bo.reshape(1, D)                                   # (1, D)

    kernel = functools.partial(
        _fused_mha_kernel, heads=heads, d_k=d_k, scale=scale,
        matmul_dtype=matmul_dtype)

    out_b, scores = pl.pallas_call(
        kernel,
        out_shape=(
            jax.ShapeDtypeStruct((B, S, D), jnp.float32),
            jax.ShapeDtypeStruct((B, heads, S, d_k), jnp.float32),
        ),
        grid=(B,),
        in_specs=[
            pl.BlockSpec((None, S, D), lambda b: (b, 0, 0)),        # q (batch b)
            pl.BlockSpec((None, S, D), lambda b: (b, 0, 0)),        # k
            pl.BlockSpec((None, S, D), lambda b: (b, 0, 0)),        # v
            pl.BlockSpec((3, D, D), lambda b: (0, 0, 0)),           # stacked W_qkv
            pl.BlockSpec((3, 1, D), lambda b: (0, 0, 0)),           # stacked b_qkv
            pl.BlockSpec((D, D), lambda b: (0, 0)),                 # W_out^T
            pl.BlockSpec((1, D), lambda b: (0, 0)),                 # b_out
        ],
        out_specs=(
            pl.BlockSpec((None, S, D), lambda b: (b, 0, 0)),             # output
            pl.BlockSpec((None, heads, S, d_k), lambda b: (b, 0, 0, 0)),  # scores
        ),
        compiler_params=pltpu.CompilerParams(
            dimension_semantics=("parallel",)),   # v7x: 2 TCs split batches
    )(qb, kb, vb, w_qkv, b_qkv, w_o_t, b_o)

    out = jnp.transpose(out_b, (1, 0, 2))                    # back to (S, B, D)
    return out, scores


# --------------------------------------------------------------------------
# Pure-JAX reference for correctness checking
# --------------------------------------------------------------------------
def mha_reference(q, k, v, params, heads):
    wq, bq, wk, bk, wv, bv, wo, bo = params
    S, B, D = q.shape
    d_k = D // heads

    def lin(x, w, b):
        return x @ w.T + b

    def to_heads(x):
        return x.reshape(S, B, heads, d_k).transpose(1, 2, 0, 3)

    qh = to_heads(lin(q, wq, bq))
    kh = to_heads(lin(k, wk, bk))
    vh = to_heads(lin(v, wv, bv))
    s = jnp.einsum('bhid,bhjd->bhij', qh, kh) / math.sqrt(d_k)
    p = jax.nn.softmax(s, axis=-1)
    scores = jnp.einsum('bhij,bhjd->bhid', p, vh)
    concat = scores.transpose(0, 2, 1, 3).reshape(B, S, D)
    out = lin(concat, wo, bo).transpose(1, 0, 2)
    return out, scores


if __name__ == "__main__":
    d_model, heads = 32, 4
    S, B = 8, 2

    key = jax.random.PRNGKey(0)
    ks = jax.random.split(key, 11)

    def winit(k, shape, sc=0.05):
        return jax.random.normal(k, shape, jnp.float32) * sc

    wq, bq = winit(ks[0], (d_model, d_model)), winit(ks[1], (d_model,))
    wk, bk = winit(ks[2], (d_model, d_model)), winit(ks[3], (d_model,))
    wv, bv = winit(ks[4], (d_model, d_model)), winit(ks[5], (d_model,))
    wo, bo = winit(ks[6], (d_model, d_model)), winit(ks[7], (d_model,))
    params = (wq, bq, wk, bk, wv, bv, wo, bo)

    q = jax.random.normal(ks[8], (S, B, d_model), jnp.float32)
    k = jax.random.normal(ks[9], (S, B, d_model), jnp.float32)
    v = jax.random.normal(ks[10], (S, B, d_model), jnp.float32)

    out, scores = mha_forward(q, k, v, params, heads)
    jax.block_until_ready((out, scores))

    ref_out, ref_scores = mha_reference(q, k, v, params, heads)
    assert out.shape == (S, B, d_model)
    assert scores.shape == (B, heads, S, d_model // heads)
    assert jnp.allclose(out, ref_out, atol=2e-3, rtol=2e-3)
    assert jnp.allclose(scores, ref_scores, atol=2e-3, rtol=2e-3)

    # bf16 MXU-operand fast path (v6e/v7x); softmax / accumulation stay f32.
    out_bf16, scores_bf16 = mha_forward(q, k, v, params, heads,
                                        matmul_dtype=jnp.bfloat16)
    jax.block_until_ready((out_bf16, scores_bf16))
    assert jnp.allclose(out_bf16, ref_out, atol=5e-2, rtol=5e-2)
    assert jnp.allclose(scores_bf16, ref_scores, atol=5e-2, rtol=5e-2)

    print("KERNEL_OK")
</pallas_src>

<mosaic_0001>
module attributes {stable_mosaic.version = 11 : i64} {
  func.func @_fused_mha_kernel(%arg0: i32, %arg1: memref<1x8x32xf32, #tpu.memory_space<vmem>>, %arg2: memref<1x8x32xf32, #tpu.memory_space<vmem>>, %arg3: memref<1x8x32xf32, #tpu.memory_space<vmem>>, %arg4: memref<3x32x32xf32, #tpu.memory_space<vmem>>, %arg5: memref<3x1x32xf32, #tpu.memory_space<vmem>>, %arg6: memref<32x32xf32, #tpu.memory_space<vmem>>, %arg7: memref<1x32xf32, #tpu.memory_space<vmem>>, %arg8: memref<1x8x32xf32, #tpu.memory_space<vmem>>, %arg9: memref<1x4x8x8xf32, #tpu.memory_space<vmem>>) attributes {dimension_semantics = [#tpu.dimension_semantics<parallel>], iteration_bounds = array<i64: 2>, scalar_prefetch = 0 : i64, scratch_operands = 0 : i64, tpu.core_type = #tpu.core_type<tc>, window_params = [{transform_indices = @transform_0, window_bounds = array<i64: 1, 8, 32>}, {transform_indices = @transform_1, window_bounds = array<i64: 1, 8, 32>}, {transform_indices = @transform_2, window_bounds = array<i64: 1, 8, 32>}, {pipeline_mode = #tpu.pipeline_mode<synchronous>, transform_indices = @transform_3, window_bounds = array<i64: 3, 32, 32>}, {pipeline_mode = #tpu.pipeline_mode<synchronous>, transform_indices = @transform_4, window_bounds = array<i64: 3, 1, 32>}, {pipeline_mode = #tpu.pipeline_mode<synchronous>, transform_indices = @transform_5, window_bounds = array<i64: 32, 32>}, {pipeline_mode = #tpu.pipeline_mode<synchronous>, transform_indices = @transform_6, window_bounds = array<i64: 1, 32>}, {transform_indices = @transform_7, window_bounds = array<i64: 1, 8, 32>}, {transform_indices = @transform_8, window_bounds = array<i64: 1, 4, 8, 8>}]} {
    %c0 = arith.constant 0 : index
    %c0_0 = arith.constant 0 : index
    %c0_1 = arith.constant 0 : index
    %0 = vector.load %arg1[%c0, %c0_0, %c0_1] : memref<1x8x32xf32, #tpu.memory_space<vmem>>, vector<1x8x32xf32>
    %1 = vector.shape_cast %0 : vector<1x8x32xf32> to vector<8x32xf32>
    %c0_2 = arith.constant 0 : index
    %c0_3 = arith.constant 0 : index
    %c0_4 = arith.constant 0 : index
    %2 = vector.load %arg4[%c0_2, %c0_3, %c0_4] : memref<3x32x32xf32, #tpu.memory_space<vmem>>, vector<1x32x32xf32>
    %3 = vector.shape_cast %2 : vector<1x32x32xf32> to vector<32x32xf32>
    %cst = arith.constant dense<0.000000e+00> : vector<8x32xf32>
    %4 = tpu.matmul %1, %3, %cst {dimension_numbers = #tpu.dot_dimension_numbers<[1], [0], [0], [1], [0, 0, 1, 1], [], []>} : vector<8x32xf32>, vector<32x32xf32>, vector<8x32xf32> -> vector<8x32xf32>
    %c0_5 = arith.constant 0 : index
    %c0_6 = arith.constant 0 : index
    %c0_7 = arith.constant 0 : index
    %5 = vector.load %arg5[%c0_5, %c0_6, %c0_7] : memref<3x1x32xf32, #tpu.memory_space<vmem>>, vector<1x1x32xf32>
    %6 = vector.shape_cast %5 : vector<1x1x32xf32> to vector<1x32xf32>
    %7 = vector.broadcast %6 : vector<1x32xf32> to vector<8x32xf32>
    %8 = arith.addf %4, %7 : vector<8x32xf32>
    %c0_8 = arith.constant 0 : index
    %c0_9 = arith.constant 0 : index
    %c0_10 = arith.constant 0 : index
    %9 = vector.load %arg2[%c0_8, %c0_9, %c0_10] : memref<1x8x32xf32, #tpu.memory_space<vmem>>, vector<1x8x32xf32>
    %10 = vector.shape_cast %9 : vector<1x8x32xf32> to vector<8x32xf32>
    %c1 = arith.constant 1 : index
    %c0_11 = arith.constant 0 : index
    %c0_12 = arith.constant 0 : index
    %11 = vector.load %arg4[%c1, %c0_11, %c0_12] : memref<3x32x32xf32, #tpu.memory_space<vmem>>, vector<1x32x32xf32>
    %12 = vector.shape_cast %11 : vector<1x32x32xf32> to vector<32x32xf32>
    %cst_13 = arith.constant dense<0.000000e+00> : vector<8x32xf32>
    %13 = tpu.matmul %10, %12, %cst_13 {dimension_numbers = #tpu.dot_dimension_numbers<[1], [0], [0], [1], [0, 0, 1, 1], [], []>} : vector<8x32xf32>, vector<32x32xf32>, vector<8x32xf32> -> vector<8x32xf32>
    %c1_14 = arith.constant 1 : index
    %c0_15 = arith.constant 0 : index
    %c0_16 = arith.constant 0 : index
    %14 = vector.load %arg5[%c1_14, %c0_15, %c0_16] : memref<3x1x32xf32, #tpu.memory_space<vmem>>, vector<1x1x32xf32>
    %15 = vector.shape_cast %14 : vector<1x1x32xf32> to vector<1x32xf32>
    %16 = vector.broadcast %15 : vector<1x32xf32> to vector<8x32xf32>
    %17 = arith.addf %13, %16 : vector<8x32xf32>
    %c0_17 = arith.constant 0 : index
    %c0_18 = arith.constant 0 : index
    %c0_19 = arith.constant 0 : index
    %18 = vector.load %arg3[%c0_17, %c0_18, %c0_19] : memref<1x8x32xf32, #tpu.memory_space<vmem>>, vector<1x8x32xf32>
    %19 = vector.shape_cast %18 : vector<1x8x32xf32> to vector<8x32xf32>
    %c2 = arith.constant 2 : index
    %c0_20 = arith.constant 0 : index
    %c0_21 = arith.constant 0 : index
    %20 = vector.load %arg4[%c2, %c0_20, %c0_21] : memref<3x32x32xf32, #tpu.memory_space<vmem>>, vector<1x32x32xf32>
    %21 = vector.shape_cast %20 : vector<1x32x32xf32> to vector<32x32xf32>
    %cst_22 = arith.constant dense<0.000000e+00> : vector<8x32xf32>
    %22 = tpu.matmul %19, %21, %cst_22 {dimension_numbers = #tpu.dot_dimension_numbers<[1], [0], [0], [1], [0, 0, 1, 1], [], []>} : vector<8x32xf32>, vector<32x32xf32>, vector<8x32xf32> -> vector<8x32xf32>
    %c2_23 = arith.constant 2 : index
    %c0_24 = arith.constant 0 : index
    %c0_25 = arith.constant 0 : index
    %23 = vector.load %arg5[%c2_23, %c0_24, %c0_25] : memref<3x1x32xf32, #tpu.memory_space<vmem>>, vector<1x1x32xf32>
    %24 = vector.shape_cast %23 : vector<1x1x32xf32> to vector<1x32xf32>
    %25 = vector.broadcast %24 : vector<1x32xf32> to vector<8x32xf32>
    %26 = arith.addf %22, %25 : vector<8x32xf32>
    %cst_26 = arith.constant 0.353553385 : f32
    %27 = vector.broadcast %cst_26 : f32 to vector<8x32xf32>
    %28 = arith.mulf %8, %27 : vector<8x32xf32>
    %29 = vector.extract_strided_slice %28 {offsets = [0, 0], sizes = [8, 8], strides = [1, 1]} : vector<8x32xf32> to vector<8x8xf32>
    %30 = vector.extract_strided_slice %17 {offsets = [0, 0], sizes = [8, 8], strides = [1, 1]} : vector<8x32xf32> to vector<8x8xf32>
    %31 = vector.extract_strided_slice %26 {offsets = [0, 0], sizes = [8, 8], strides = [1, 1]} : vector<8x32xf32> to vector<8x8xf32>
    %cst_27 = arith.constant dense<0.000000e+00> : vector<8x8xf32>
    %32 = tpu.matmul %29, %30, %cst_27 {dimension_numbers = #tpu.dot_dimension_numbers<[1], [1], [0], [0], [0, 0, 1, 0], [], []>} : vector<8x8xf32>, vector<8x8xf32>, vector<8x8xf32> -> vector<8x8xf32>
    %cst_28 = arith.constant dense<0xFF800000> : vector<8xf32>
    %33 = vector.multi_reduction <maximumf>, %32, %cst_28 [1] : vector<8x8xf32> to vector<8xf32>
    %34 = vector.shape_cast %33 : vector<8xf32> to vector<8x1xf32>
    %35 = vector.broadcast %34 : vector<8x1xf32> to vector<8x8xf32>
    %36 = arith.subf %32, %35 : vector<8x8xf32>
    %37 = math.exp %36 : vector<8x8xf32>
    %cst_29 = arith.constant dense<0.000000e+00> : vector<8xf32>
    %38 = vector.multi_reduction <add>, %37, %cst_29 [1] : vector<8x8xf32> to vector<8xf32>
    %39 = vector.shape_cast %38 : vector<8xf32> to vector<8x1xf32>
    %40 = tpu.reciprocal %39 {approx = true} : vector<8x1xf32> -> vector<8x1xf32>
    %41 = vector.broadcast %40 : vector<8x1xf32> to vector<8x8xf32>
    %42 = arith.mulf %37, %41 : vector<8x8xf32>
    %cst_30 = arith.constant dense<0.000000e+00> : vector<8x8xf32>
    %43 = tpu.matmul %42, %31, %cst_30 {dimension_numbers = #tpu.dot_dimension_numbers<[1], [0], [0], [1], [0, 0, 1, 1], [], []>} : vector<8x8xf32>, vector<8x8xf32>, vector<8x8xf32> -> vector<8x8xf32>
    %c0_31 = arith.constant 0 : index
    %c0_32 = arith.constant 0 : index
    %c0_33 = arith.constant 0 : index
    %c0_34 = arith.constant 0 : index
    %44 = vector.load %arg9[%c0_31, %c0_32, %c0_33, %c0_34] : memref<1x4x8x8xf32, #tpu.memory_space<vmem>>, vector<1x1x8x8xf32>
    %45 = vector.shape_cast %44 : vector<1x1x8x8xf32> to vector<8x8xf32>
    %46 = vector.shape_cast %43 : vector<8x8xf32> to vector<1x1x8x8xf32>
    tpu.vector_store %arg9[%c0_31, %c0_32, %c0_33, %c0_34], %46 {strides = array<i32>} : memref<1x4x8x8xf32, #tpu.memory_space<vmem>>, vector<1x1x8x8xf32>,
    %47 = vector.extract_strided_slice %28 {offsets = [0, 8], sizes = [8, 8], strides = [1, 1]} : vector<8x32xf32> to vector<8x8xf32>
    %48 = vector.extract_strided_slice %17 {offsets = [0, 8], sizes = [8, 8], strides = [1, 1]} : vector<8x32xf32> to vector<8x8xf32>
    %49 = vector.extract_strided_slice %26 {offsets = [0, 8], sizes = [8, 8], strides = [1, 1]} : vector<8x32xf32> to vector<8x8xf32>
    %cst_35 = arith.constant dense<0.000000e+00> : vector<8x8xf32>
    %50 = tpu.matmul %47, %48, %cst_35 {dimension_numbers = #tpu.dot_dimension_numbers<[1], [1], [0], [0], [0, 0, 1, 0], [], []>} : vector<8x8xf32>, vector<8x8xf32>, vector<8x8xf32> -> vector<8x8xf32>
    %cst_36 = arith.constant dense<0xFF800000> : vector<8xf32>
    %51 = vector.multi_reduction <maximumf>, %50, %cst_36 [1] : vector<8x8xf32> to vector<8xf32>
    %52 = vector.shape_cast %51 : vector<8xf32> to vector<8x1xf32>
    %53 = vector.broadcast %52 : vector<8x1xf32> to vector<8x8xf32>
    %54 = arith.subf %50, %53 : vector<8x8xf32>
    %55 = math.exp %54 : vector<8x8xf32>
    %cst_37 = arith.constant dense<0.000000e+00> : vector<8xf32>
    %56 = vector.multi_reduction <add>, %55, %cst_37 [1] : vector<8x8xf32> to vector<8xf32>
    %57 = vector.shape_cast %56 : vector<8xf32> to vector<8x1xf32>
    %58 = tpu.reciprocal %57 {approx = true} : vector<8x1xf32> -> vector<8x1xf32>
    %59 = vector.broadcast %58 : vector<8x1xf32> to vector<8x8xf32>
    %60 = arith.mulf %55, %59 : vector<8x8xf32>
    %cst_38 = arith.constant dense<0.000000e+00> : vector<8x8xf32>
    %61 = tpu.matmul %60, %49, %cst_38 {dimension_numbers = #tpu.dot_dimension_numbers<[1], [0], [0], [1], [0, 0, 1, 1], [], []>} : vector<8x8xf32>, vector<8x8xf32>, vector<8x8xf32> -> vector<8x8xf32>
    %c0_39 = arith.constant 0 : index
    %c1_40 = arith.constant 1 : index
    %c0_41 = arith.constant 0 : index
    %c0_42 = arith.constant 0 : index
    %62 = vector.load %arg9[%c0_39, %c1_40, %c0_41, %c0_42] : memref<1x4x8x8xf32, #tpu.memory_space<vmem>>, vector<1x1x8x8xf32>
    %63 = vector.shape_cast %62 : vector<1x1x8x8xf32> to vector<8x8xf32>
    %64 = vector.shape_cast %61 : vector<8x8xf32> to vector<1x1x8x8xf32>
    tpu.vector_store %arg9[%c0_39, %c1_40, %c0_41, %c0_42], %64 {strides = array<i32>} : memref<1x4x8x8xf32, #tpu.memory_space<vmem>>, vector<1x1x8x8xf32>,
    %65 = vector.extract_strided_slice %28 {offsets = [0, 16], sizes = [8, 8], strides = [1, 1]} : vector<8x32xf32> to vector<8x8xf32>
    %66 = vector.extract_strided_slice %17 {offsets = [0, 16], sizes = [8, 8], strides = [1, 1]} : vector<8x32xf32> to vector<8x8xf32>
    %67 = vector.extract_strided_slice %26 {offsets = [0, 16], sizes = [8, 8], strides = [1, 1]} : vector<8x32xf32> to vector<8x8xf32>
    %cst_43 = arith.constant dense<0.000000e+00> : vector<8x8xf32>
    %68 = tpu.matmul %65, %66, %cst_43 {dimension_numbers = #tpu.dot_dimension_numbers<[1], [1], [0], [0], [0, 0, 1, 0], [], []>} : vector<8x8xf32>, vector<8x8xf32>, vector<8x8xf32> -> vector<8x8xf32>
    %cst_44 = arith.constant dense<0xFF800000> : vector<8xf32>
    %69 = vector.multi_reduction <maximumf>, %68, %cst_44 [1] : vector<8x8xf32> to vector<8xf32>
    %70 = vector.shape_cast %69 : vector<8xf32> to vector<8x1xf32>
    %71 = vector.broadcast %70 : vector<8x1xf32> to vector<8x8xf32>
    %72 = arith.subf %68, %71 : vector<8x8xf32>
    %73 = math.exp %72 : vector<8x8xf32>
    %cst_45 = arith.constant dense<0.000000e+00> : vector<8xf32>
    %74 = vector.multi_reduction <add>, %73, %cst_45 [1] : vector<8x8xf32> to vector<8xf32>
    %75 = vector.shape_cast %74 : vector<8xf32> to vector<8x1xf32>
    %76 = tpu.reciprocal %75 {approx = true} : vector<8x1xf32> -> vector<8x1xf32>
    %77 = vector.broadcast %76 : vector<8x1xf32> to vector<8x8xf32>
    %78 = arith.mulf %73, %77 : vector<8x8xf32>
    %cst_46 = arith.constant dense<0.000000e+00> : vector<8x8xf32>
    %79 = tpu.matmul %78, %67, %cst_46 {dimension_numbers = #tpu.dot_dimension_numbers<[1], [0], [0], [1], [0, 0, 1, 1], [], []>} : vector<8x8xf32>, vector<8x8xf32>, vector<8x8xf32> -> vector<8x8xf32>
    %c0_47 = arith.constant 0 : index
    %c2_48 = arith.constant 2 : index
    %c0_49 = arith.constant 0 : index
    %c0_50 = arith.constant 0 : index
    %80 = vector.load %arg9[%c0_47, %c2_48, %c0_49, %c0_50] : memref<1x4x8x8xf32, #tpu.memory_space<vmem>>, vector<1x1x8x8xf32>
    %81 = vector.shape_cast %80 : vector<1x1x8x8xf32> to vector<8x8xf32>
    %82 = vector.shape_cast %79 : vector<8x8xf32> to vector<1x1x8x8xf32>
    tpu.vector_store %arg9[%c0_47, %c2_48, %c0_49, %c0_50], %82 {strides = array<i32>} : memref<1x4x8x8xf32, #tpu.memory_space<vmem>>, vector<1x1x8x8xf32>,
    %83 = vector.extract_strided_slice %28 {offsets = [0, 24], sizes = [8, 8], strides = [1, 1]} : vector<8x32xf32> to vector<8x8xf32>
    %84 = vector.extract_strided_slice %17 {offsets = [0, 24], sizes = [8, 8], strides = [1, 1]} : vector<8x32xf32> to vector<8x8xf32>
    %85 = vector.extract_strided_slice %26 {offsets = [0, 24], sizes = [8, 8], strides = [1, 1]} : vector<8x32xf32> to vector<8x8xf32>
    %cst_51 = arith.constant dense<0.000000e+00> : vector<8x8xf32>
    %86 = tpu.matmul %83, %84, %cst_51 {dimension_numbers = #tpu.dot_dimension_numbers<[1], [1], [0], [0], [0, 0, 1, 0], [], []>} : vector<8x8xf32>, vector<8x8xf32>, vector<8x8xf32> -> vector<8x8xf32>
    %cst_52 = arith.constant dense<0xFF800000> : vector<8xf32>
    %87 = vector.multi_reduction <maximumf>, %86, %cst_52 [1] : vector<8x8xf32> to vector<8xf32>
    %88 = vector.shape_cast %87 : vector<8xf32> to vector<8x1xf32>
    %89 = vector.broadcast %88 : vector<8x1xf32> to vector<8x8xf32>
    %90 = arith.subf %86, %89 : vector<8x8xf32>
    %91 = math.exp %90 : vector<8x8xf32>
    %cst_53 = arith.constant dense<0.000000e+00> : vector<8xf32>
    %92 = vector.multi_reduction <add>, %91, %cst_53 [1] : vector<8x8xf32> to vector<8xf32>
    %93 = vector.shape_cast %92 : vector<8xf32> to vector<8x1xf32>
    %94 = tpu.reciprocal %93 {approx = true} : vector<8x1xf32> -> vector<8x1xf32>
    %95 = vector.broadcast %94 : vector<8x1xf32> to vector<8x8xf32>
    %96 = arith.mulf %91, %95 : vector<8x8xf32>
    %cst_54 = arith.constant dense<0.000000e+00> : vector<8x8xf32>
    %97 = tpu.matmul %96, %85, %cst_54 {dimension_numbers = #tpu.dot_dimension_numbers<[1], [0], [0], [1], [0, 0, 1, 1], [], []>} : vector<8x8xf32>, vector<8x8xf32>, vector<8x8xf32> -> vector<8x8xf32>
    %c0_55 = arith.constant 0 : index
    %c3 = arith.constant 3 : index
    %c0_56 = arith.constant 0 : index
    %c0_57 = arith.constant 0 : index
    %98 = vector.load %arg9[%c0_55, %c3, %c0_56, %c0_57] : memref<1x4x8x8xf32, #tpu.memory_space<vmem>>, vector<1x1x8x8xf32>
    %99 = vector.shape_cast %98 : vector<1x1x8x8xf32> to vector<8x8xf32>
    %100 = vector.shape_cast %97 : vector<8x8xf32> to vector<1x1x8x8xf32>
    tpu.vector_store %arg9[%c0_55, %c3, %c0_56, %c0_57], %100 {strides = array<i32>} : memref<1x4x8x8xf32, #tpu.memory_space<vmem>>, vector<1x1x8x8xf32>,
    %101 = tpu.concatenate %43, %61, %79, %97 in 1 : vector<8x8xf32>, vector<8x8xf32>, vector<8x8xf32>, vector<8x8xf32> -> vector<8x32xf32>
    %c0_58 = arith.constant 0 : index
    %c0_59 = arith.constant 0 : index
    %102 = vector.load %arg6[%c0_58, %c0_59] : memref<32x32xf32, #tpu.memory_space<vmem>>, vector<32x32xf32>
    %cst_60 = arith.constant dense<0.000000e+00> : vector<8x32xf32>
    %103 = tpu.matmul %101, %102, %cst_60 {dimension_numbers = #tpu.dot_dimension_numbers<[1], [0], [0], [1], [0, 0, 1, 1], [], []>} : vector<8x32xf32>, vector<32x32xf32>, vector<8x32xf32> -> vector<8x32xf32>
    %c0_61 = arith.constant 0 : index
    %c0_62 = arith.constant 0 : index
    %104 = vector.load %arg7[%c0_61, %c0_62] : memref<1x32xf32, #tpu.memory_space<vmem>>, vector<1x32xf32>
    %105 = vector.broadcast %104 : vector<1x32xf32> to vector<8x32xf32>
    %106 = arith.addf %103, %105 : vector<8x32xf32>
    %c0_63 = arith.constant 0 : index
    %c0_64 = arith.constant 0 : index
    %c0_65 = arith.constant 0 : index
    %107 = vector.load %arg8[%c0_63, %c0_64, %c0_65] : memref<1x8x32xf32, #tpu.memory_space<vmem>>, vector<1x8x32xf32>
    %108 = vector.shape_cast %107 : vector<1x8x32xf32> to vector<8x32xf32>
    %109 = vector.shape_cast %106 : vector<8x32xf32> to vector<1x8x32xf32>
    tpu.vector_store %arg8[%c0_63, %c0_64, %c0_65], %109 {strides = array<i32>} : memref<1x8x32xf32, #tpu.memory_space<vmem>>, vector<1x8x32xf32>,
    return
  }
  func.func @transform_0(%arg0: i32) -> (i32, i32, i32) {
    %c0_i32 = arith.constant 0 : i32
    %c0_i32_0 = arith.constant 0 : i32
    %c0_i32_1 = arith.constant 0 : i32
    return %arg0, %c0_i32, %c0_i32_0 : i32, i32, i32
  }
  func.func @transform_1(%arg0: i32) -> (i32, i32, i32) {
    %c0_i32 = arith.constant 0 : i32
    %c0_i32_0 = arith.constant 0 : i32
    %c0_i32_1 = arith.constant 0 : i32
    return %arg0, %c0_i32, %c0_i32_0 : i32, i32, i32
  }
  func.func @transform_2(%arg0: i32) -> (i32, i32, i32) {
    %c0_i32 = arith.constant 0 : i32
    %c0_i32_0 = arith.constant 0 : i32
    %c0_i32_1 = arith.constant 0 : i32
    return %arg0, %c0_i32, %c0_i32_0 : i32, i32, i32
  }
  func.func @transform_3(%arg0: i32) -> (i32, i32, i32) {
    %c0_i32 = arith.constant 0 : i32
    %c0_i32_0 = arith.constant 0 : i32
    %c0_i32_1 = arith.constant 0 : i32
    %c0_i32_2 = arith.constant 0 : i32
    return %c0_i32, %c0_i32_0, %c0_i32_1 : i32, i32, i32
  }
  func.func @transform_4(%arg0: i32) -> (i32, i32, i32) {
    %c0_i32 = arith.constant 0 : i32
    %c0_i32_0 = arith.constant 0 : i32
    %c0_i32_1 = arith.constant 0 : i32
    %c0_i32_2 = arith.constant 0 : i32
    return %c0_i32, %c0_i32_0, %c0_i32_1 : i32, i32, i32
  }
  func.func @transform_5(%arg0: i32) -> (i32, i32) {
    %c0_i32 = arith.constant 0 : i32
    %c0_i32_0 = arith.constant 0 : i32
    %c0_i32_1 = arith.constant 0 : i32
    return %c0_i32, %c0_i32_0 : i32, i32
  }
  func.func @transform_6(%arg0: i32) -> (i32, i32) {
    %c0_i32 = arith.constant 0 : i32
    %c0_i32_0 = arith.constant 0 : i32
    %c0_i32_1 = arith.constant 0 : i32
    return %c0_i32, %c0_i32_0 : i32, i32
  }
  func.func @transform_7(%arg0: i32) -> (i32, i32, i32) {
    %c0_i32 = arith.constant 0 : i32
    %c0_i32_0 = arith.constant 0 : i32
    %c0_i32_1 = arith.constant 0 : i32
    return %arg0, %c0_i32, %c0_i32_0 : i32, i32, i32
  }
  func.func @transform_8(%arg0: i32) -> (i32, i32, i32, i32) {
    %c0_i32 = arith.constant 0 : i32
    %c0_i32_0 = arith.constant 0 : i32
    %c0_i32_1 = arith.constant 0 : i32
    %c0_i32_2 = arith.constant 0 : i32
    return %arg0, %c0_i32, %c0_i32_0, %c0_i32_1 : i32, i32, i32, i32
  }
}

</mosaic_0001>

<bundles_post_ra>
// kernel: tpu_custom_call.1
= control target key start
LH: loop header
LB: loop body
LE: loop exit
PB: predicated region body
PF: predicated region fallthrough
CT: control target
= control target key end

     0   :  { %s2735_s0 = inlined_call_operand.hbm [shape: f32[2,8,32], index: 0, kind: input, shape index: {}]   ;;  %s2736_s1 = inlined_call_operand.hbm [shape: f32[2,8,32], index: 1, kind: input, shape index: {}]   ;;  %s2737_s2 = inlined_call_operand.hbm [shape: f32[2,8,32], index: 2, kind: input, shape index: {}]   ;;  %s2738_s3 = inlined_call_operand.hbm [shape: f32[3,32,32], index: 3, kind: input, shape index: {}]   ;;  %s2739_s4 = inlined_call_operand.vmem [shape: f32[3,1,32], index: 4, kind: input, shape index: {}]   ;;  %s2740_s5 = inlined_call_operand.hbm [shape: f32[32,32], index: 5, kind: input, shape index: {}]   ;;  %s2741_s6 = inlined_call_operand.vmem [shape: f32[1,32], index: 6, kind: input, shape index: {}]   ;;  %s2742_s7 = inlined_call_operand.hbm [shape: f32[2,8,32], index: 7, kind: output, shape index: {0}]   ;;  %s2743_s8 = inlined_call_operand.hbm [shape: f32[2,4,8,8], index: 8, kind: output, shape index: {1}]  }
   0x1   :  { %2762 = sst [smem:[#allocation23_spill]] %s2736_s1 }
   0x2   :  { %2763 = sst [smem:[#allocation24_spill]] %s2738_s3 }
   0x3   :  { %14 = vsyncpa [#allocation3], 0 }
   0x4   :  { %16 = vsyncpa [#allocation3 + $0x1], 0 }
   0x5   :  { %17 = vsyncpa [#allocation6], 0 }
   0x6   :  { %19 = vsyncpa [#allocation6 + $0x1], 0 }
   0x7   :  { %20 = vsyncpa [#allocation9], 0 }
   0x8   :  { %21 = vsyncpa [#allocation4], 0 }
   0x9   :  { %23 = vsyncpa [#allocation4 + $0x1], 0 }
   0xa   :  { %24 = vsyncpa [#allocation13], 0 }
   0xb   :  { %26 = vsyncpa [#allocation13 + $0x1], 0  ;;  %s2282_s27 = smov 0   ;;  %s2284_s28 = smov 0  }
   0xc   :  { %s2286_s29 = smov 0   ;;  %s2288_s30 = smov 0  }
   0xd LB: > { %2764 = sst [smem:[#allocation19_spill]] %s2216_s30  ;;  %s2303_s9 = sadd.s32 4294967295, %s2216_s30   ;;  %s2216_s30 = sphi %s2288_s30, %s2796_s30   ;;  %s2212_s29 = sphi %s2286_s29, %s2800_s29   ;;  %s2208_s28 = sphi %s2284_s28, %s2799_s28   ;;  %s2204_s27 = sphi %s2282_s27, %s2798_s27  }
   0xe   : > { %s1658_s10 = sadd.s32 4294967294, %s2216_s30   ;;  %p52_p0 = scmp.ne.s32.totalorder %s2208_s28, %s2204_s27 }
   0xf   : > { %p2744_p1 = scmp.eq.s32.totalorder %s2303_s9, 0  ;;  %p218_p3 = scmp.eq.s32.totalorder %s1658_s10, 1 }
  0x10   : > { %p1659_p5 = scmp.ge.s32.totalorder %s2216_s30, 1  ;;  %p251_p7 = scmp.lt.s32.totalorder %s2216_s30, 3 }
  0x11   : > { %p2312_p4 = por %p2744_p1, %p52_p0  ;;  %p2317_p6 = por %p218_p3, %p52_p0 }
  0x12   : > { %p2322_p8 = pnand %p1659_p5, %p251_p7  ;;  %s2218_s14 = smov [#allocation8]  }
  0x13   : > { %s2765_s11 = scalar_select %p2312_p4, 1, 0 }
  0x14   : > { %s2766_s12 = scalar_select %p2317_p6, 1, 0 }
  0x15   : > { %s2768_s13 = scalar_select %p2322_p8, 1, 0 }
  0x16   : > { %2767 = sst [smem:[#allocation20_spill]] %s2766_s12  ;;  %s263_s15 = sshll.u32 %s2218_s14, 4  ;;  %s2326_s15 = int_to_ptr.vmem [resolvable:$true] %s263_s15 }
  0x17   : > { %p1872_p9 = pneg %p2322_p8  ;;  %s2338_s17 = sadd.s32 1, %s2216_s30  }
  0x18   : > { %2770 = sst [smem:[#allocation21_spill]] %s2338_s17  ;;  %s39_s18 = sadd.s32 1, %s2212_s29 }
  0x19   : > { %p2333_p11 = pnand %p1872_p9, %p2744_p1  ;;  %s36_s19 = ssub.s32 %s2216_s30, %s2338_s17 }
  0x1a   : > { %s2771_s3 = sld [smem:[#allocation24_spill]] }
  0x1b   : > { %s2769_s16 = scalar_select %p2333_p11, 1, 0 }
  0x1c   : > { %p2751_p13 = pneg %p2333_p11 }
  0x20   : > { %s1964_s22 = scalar_lea.hbm %s2771_s3, 1536 }
  0x21   : > { %p1965_p12 = scmp.ne.s32.totalorder %s2771_s3, %s1964_s22  ;;  %p1971_p5 = scmp.lt.u32.totalorder %s1964_s22, %s2771_s3 }
  0x23   : > { %p1967_p0 = pnand %p2751_p13, %p1965_p12 }
  0x25   : > { %p1968_p3 = pneg %p1967_p0 }
  0x27   : > { %p1973_p7 = pnand %p1971_p5, %p1968_p3 }
  0x29   : > { %1976 = shalt.err (!%p1973_p7)
}
  0x2a   : > { %s1977_s10 = scalar_lea.vmem %s2326_s15, 1536  ;;  %p1985_p2 = scmp.lt.s32.totalorder %s2326_s15, %s2326_s15 }
  0x2b   : > { %p1978_p9 = scmp.ne.s32.totalorder %s2326_s15, %s1977_s10  ;;  %p1986_p12 = scmp.lt.s32.totalorder %s1977_s10, %s1977_s10 }
  0x2d   : > { %p1980_p10 = pnand %p1978_p9, %p2751_p13  ;;  %p1987_p0 = por %p1986_p12, %p1985_p2 }
  0x2f   : > { %p1981_p1 = pneg %p1980_p10 }
  0x31   : > { %p1988_p6 = pnand %p1987_p0, %p1981_p1 }
  0x33   : > { %1991 = shalt.err (!%p1988_p6)
}
  0x34   : > { %s2745_s14 = smov 128   ;;  %s2746_s20 = smov 8  }
  0x35   : > { %1875 = dma.hbm_to_vmem [thread:$0]  (!%p2333_p11), %s2771_s3, 1536, %s2326_s15, [#allocation9], %s2745_s14, %s2745_s14, %s2746_s20  }
  0x36   : > { %p37_p1 = scmp.eq.s32.totalorder %s36_s19, 0  ;;  %p46_p2 = scmp.ne.s32.totalorder %s2212_s29, %s2208_s28 }
  0x37   : > { %p47_p6 = scmp.eq.s32.totalorder %s2216_s30, 0  ;;  %p1898_p10 = scmp.lt.s32.totalorder %s2216_s30, 2 }
  0x38   : > { %s2378_s23 = scalar_select %p37_p1, %s2212_s29, %s39_s18  }
  0x39   : > { %p48_p3 = por %p47_p6, %p46_p2  ;;  %p2773_p5 = scmp.eq.s32.totalorder %s2303_s9, 1 }
  0x3a   : > { %2772 = sst [smem:[#allocation22_spill]] %s2378_s23  ;;  %s2747_s25 = sand.u32 1, %s2212_s29  }
  0x3b   : > { %p2382_p7 = por %p2773_p5, %p46_p2  ;;  %s2388_s26 = sshll.u32 %s2216_s30, 7 }
  0x3c   : > { %s2392_s10 = sshll.u32 %s2747_s25, 3  ;;  %p2394_p9 = pnand %p1898_p10, %p48_p3 }
  0x3d   : > { %s2774_s24 = scalar_select %p2382_p7, 1, 0 }
  0x3e   : > { %s2775_s15 = scalar_select %p2394_p9, 1, 0 }
  0x3f   : > { %s314_s18 = sand.u32 1, %s2216_s30   ;;  %s2776_s1 = sld [smem:[#allocation23_spill]] }
  0x40   : > { %s318_s14 = scalar_lea.vmem [#allocation5], %s2392_s10  ;;  %s2408_s25 = scalar_lea.sflag [#allocation6], %s314_s18 }
  0x41   : > { %s325_s20 = sshll.u32 %s318_s14, 4  ;;  %p2414_p0 = pneg %p2394_p9  ;;  %s2406_s20 = int_to_ptr.vmem [resolvable:$true] %s325_s20 }
  0x43   : > { %s2777_s23 = scalar_select %p2414_p0, 1, 0 }
  0x45   : > { %s2403_s22 = scalar_lea.hbm %s2776_s1, %s2388_s26  ;;  %s1997_s17 = scalar_lea.hbm %s2776_s1, 256 }
  0x46   : > { %s1992_s3 = scalar_lea.hbm %s2403_s22, 128  ;;  %p1998_p6 = scmp.lt.u32.totalorder %s2403_s22, %s2776_s1 }
  0x47   : > { %p1993_p12 = scmp.ne.s32.totalorder %s2403_s22, %s1992_s3  ;;  %p1999_p10 = scmp.lt.u32.totalorder %s1997_s17, %s1992_s3 }
  0x48   : > { %p2001_p5 = scmp.lt.u32.totalorder %s1992_s3, %s2403_s22 }
  0x49   : > { %p1995_p1 = pnand %p2414_p0, %p1993_p12  ;;  %p2000_p3 = por %p1999_p10, %p1998_p6 }
  0x4b   : > { %p1996_p2 = pneg %p1995_p1  ;;  %p2002_p13 = por %p2001_p5, %p2000_p3 }
  0x4d   : > { %p2003_p7 = pnand %p2002_p13, %p1996_p2 }
  0x4f   : > { %2006 = shalt.err (!%p2003_p7)
}
  0x50   : > { %s2007_s18 = scalar_lea.vmem %s2406_s20, 128  ;;  %s2221_s19 = smov [#allocation5]  }
  0x51   : > { %p2008_p12 = scmp.ne.s32.totalorder %s2406_s20, %s2007_s18  ;;  %s2012_s21 = sshll.u32 %s2221_s19, 4  ;;  %s2013_s21 = int_to_ptr.vmem [resolvable:$false] %s2012_s21 }
  0x52   : > { %s2014_s30 = scalar_lea.vmem %s2013_s21, 256  ;;  %p2015_p8 = scmp.lt.s32.totalorder %s2406_s20, %s2013_s21 }
  0x53   : > { %p2010_p1 = pnand %p2008_p12, %p2414_p0  ;;  %p2016_p11 = scmp.lt.s32.totalorder %s2014_s30, %s2007_s18 }
  0x55   : > { %p2011_p4 = pneg %p2010_p1  ;;  %p2017_p6 = por %p2016_p11, %p2015_p8 }
  0x57   : > { %p2018_p10 = pnand %p2017_p6, %p2011_p4 }
  0x59   : > { %2021 = shalt.err (!%p2018_p10)
}
  0x5a   : > { %1885 = dma.hbm_to_vmem [thread:$0]  (!%p2394_p9), %s2403_s22, 128, %s2406_s20, %s2408_s25  }
  0x5b   : > { %s2222_s3 = smov [#allocation10]   ;;  %s2022_s19 = scalar_lea.hbm %s2740_s5, 512 }
  0x5c   : > { %s279_s17 = sshll.u32 %s2222_s3, 4  ;;  %p2023_p8 = scmp.ne.s32.totalorder %s2740_s5, %s2022_s19  ;;  %s280_s17 = int_to_ptr.vmem [resolvable:$true] %s279_s17 }
  0x5d   : > { %p2778_p4 = scmp.ne.s32.totalorder %s2769_s16, 0  ;;  %p2029_p2 = scmp.lt.u32.totalorder %s2022_s19, %s2740_s5 }
  0x5f   : > { %p2779_p11 = pneg %p2778_p4 }
  0x61   : > { %p2025_p13 = pnand %p2023_p8, %p2779_p11 }
  0x63   : > { %p2026_p7 = pneg %p2025_p13 }
  0x65   : > { %p2031_p3 = pnand %p2029_p2, %p2026_p7 }
  0x67   : > { %2034 = shalt.err (!%p2031_p3)
}
  0x68   : > { %s2035_s20 = scalar_lea.vmem %s280_s17, 512  ;;  %p2780_p12 = pmov %p2779_p11 }
  0x69   : > { %p2036_p5 = scmp.ne.s32.totalorder %s280_s17, %s2035_s20  ;;  %p2043_p10 = scmp.lt.s32.totalorder %s280_s17, %s280_s17 }
  0x6a   : > { %p2044_p9 = scmp.lt.s32.totalorder %s2035_s20, %s2035_s20 }
  0x6b   : > { %p2038_p1 = pnand %p2036_p5, %p2780_p12 }
  0x6c   : > { %p2045_p0 = por %p2044_p9, %p2043_p10 }
  0x6d   : > { %p2039_p6 = pneg %p2038_p1 }
  0x6f   : > { %p2046_p8 = pnand %p2045_p0, %p2039_p6 }
  0x71   : > { %2049 = shalt.err (!%p2046_p8)
}
  0x72   : > { %s2781_s1 = smov 8   ;;  %s2782_s12 = smov 128  }
  0x73   : > { %1878 = dma.hbm_to_vmem [thread:$0]  (!%p2778_p4), %s2740_s5, 512, %s280_s17, [#allocation9], %s2782_s12, %s2782_s12, %s2781_s1  }
  0x74   : > { %s2465_s21 = scalar_lea.hbm %s2735_s0, %s2388_s26  ;;  %s300_s16 = scalar_lea.vmem [#allocation2], %s2392_s10 }
  0x75   : > { %s307_s18 = sshll.u32 %s300_s16, 4  ;;  %s2783_s30 = sand.u32 1, %s2212_s29   ;;  %s308_s18 = int_to_ptr.vmem [resolvable:$true] %s307_s18 }
  0x76   : > { %s297_s20 = scalar_lea.sflag [#allocation3], %s2783_s30  ;;  %s2050_s22 = scalar_lea.hbm %s2465_s21, 128 }
  0x77   : > { %p2051_p9 = scmp.ne.s32.totalorder %s2465_s21, %s2050_s22  ;;  %p2784_p0 = scmp.ne.s32.totalorder %s2777_s23, 0 }
  0x78   : > { %s2055_s12 = scalar_lea.hbm %s2735_s0, 256  ;;  %p2056_p4 = scmp.lt.u32.totalorder %s2465_s21, %s2735_s0 }
  0x79   : > { %p2053_p11 = pnand %p2051_p9, %p2784_p0  ;;  %p2057_p7 = scmp.lt.u32.totalorder %s2055_s12, %s2050_s22 }
  0x7a   : > { %p2059_p3 = scmp.lt.u32.totalorder %s2050_s22, %s2465_s21 }
  0x7b   : > { %p2054_p13 = pneg %p2053_p11  ;;  %p2058_p2 = por %p2057_p7, %p2056_p4 }
  0x7d   : > { %p2060_p5 = por %p2059_p3, %p2058_p2 }
  0x7f   : > { %p2061_p12 = pnand %p2060_p5, %p2054_p13 }
  0x81   : > { %2064 = shalt.err (!%p2061_p12)
}
  0x82   : > { %s2065_s19 = scalar_lea.vmem %s308_s18, 128  ;;  %s2223_s16 = smov [#allocation2]  }
  0x83   : > { %p2066_p1 = scmp.ne.s32.totalorder %s308_s18, %s2065_s19  ;;  %s2070_s30 = sshll.u32 %s2223_s16, 4  ;;  %s2071_s30 = int_to_ptr.vmem [resolvable:$false] %s2070_s30 }
  0x84   : > { %s2072_s17 = scalar_lea.vmem %s2071_s30, 256  ;;  %p2073_p8 = scmp.lt.s32.totalorder %s308_s18, %s2071_s30 }
  0x85   : > { %p2068_p6 = pnand %p2066_p1, %p2784_p0  ;;  %p2074_p9 = scmp.lt.s32.totalorder %s2072_s17, %s2065_s19 }
  0x87   : > { %p2069_p10 = pneg %p2068_p6  ;;  %p2075_p11 = por %p2074_p9, %p2073_p8 }
  0x89   : > { %p2076_p4 = pnand %p2075_p11, %p2069_p10 }
  0x8b   : > { %2079 = shalt.err (!%p2076_p4)
}
  0x8c   : > { %p2785_p7 = scmp.ne.s32.totalorder %s2775_s15, 0  ;;  %s2491_s12 = scalar_lea.hbm %s2737_s2, %s2388_s26 }
  0x8d   : > { %s336_s3 = scalar_lea.vmem [#allocation7], %s2392_s10  ;;  %s2080_s19 = scalar_lea.hbm %s2491_s12, 128 }
  0x8e   : > { %1882 = dma.hbm_to_vmem [thread:$0]  (!%p2785_p7), %s2465_s21, 128, %s308_s18, %s297_s20  }
  0x8f   : > { %s343_s14 = sshll.u32 %s336_s3, 4  ;;  %p2081_p13 = scmp.ne.s32.totalorder %s2491_s12, %s2080_s19  ;;  %s344_s14 = int_to_ptr.vmem [resolvable:$true] %s343_s14 }
  0x90   : > { %s2085_s21 = scalar_lea.hbm %s2737_s2, 256  ;;  %p2086_p5 = scmp.lt.u32.totalorder %s2491_s12, %s2737_s2 }
  0x91   : > { %p2083_p2 = pnand %p2081_p13, %p2784_p0  ;;  %p2087_p12 = scmp.lt.u32.totalorder %s2085_s21, %s2080_s19 }
  0x92   : > { %p2089_p6 = scmp.lt.u32.totalorder %s2080_s19, %s2491_s12 }
  0x93   : > { %p2084_p3 = pneg %p2083_p2  ;;  %p2088_p1 = por %p2087_p12, %p2086_p5 }
  0x95   : > { %p2090_p10 = por %p2089_p6, %p2088_p1 }
  0x97   : > { %p2091_p8 = pnand %p2090_p10, %p2084_p3 }
  0x99   : > { %2094 = shalt.err (!%p2091_p8)
}
  0x9a   : > { %s2095_s26 = scalar_lea.vmem %s344_s14, 128  ;;  %s2224_s10 = smov [#allocation7]  }
  0x9b   : > { %p2096_p9 = scmp.ne.s32.totalorder %s344_s14, %s2095_s26  ;;  %s2100_s17 = sshll.u32 %s2224_s10, 4  ;;  %s2101_s17 = int_to_ptr.vmem [resolvable:$false] %s2100_s17 }
  0x9c   : > { %s2102_s22 = scalar_lea.vmem %s2101_s17, 256  ;;  %p2103_p13 = scmp.lt.s32.totalorder %s344_s14, %s2101_s17 }
  0x9d   : > { %p2098_p11 = pnand %p2096_p9, %p2784_p0  ;;  %p2104_p2 = scmp.lt.s32.totalorder %s2102_s22, %s2095_s26 }
  0x9f   : > { %p2099_p4 = pneg %p2098_p11  ;;  %p2105_p7 = por %p2104_p2, %p2103_p13 }
  0xa1   : > { %p2106_p5 = pnand %p2105_p7, %p2099_p4 }
  0xa3   : > { %2109 = shalt.err (!%p2106_p5)
}
  0xa4   : > { %p2786_p12 = scmp.ne.s32.totalorder %s2775_s15, 0  ;;  %p2787_p3 = scmp.ne.s32.totalorder %s2768_s13, 0 }
  0xa5   : > { %s2515_s23 = sand.u32 (!%p2787_p3), 1, %s2208_s28   ;;  %p2788_p0 = scmp.ne.s32.totalorder (!%p2787_p3), %s2765_s11, 0 }
  0xa6   : > { %1888 = dma.hbm_to_vmem [thread:$0]  (!%p2786_p12), %s2491_s12, 128, %s344_s14, %s2408_s25  }
  0xa7   : > { %352 = sbr.rel (%p2787_p3) target bundleno = 2085 (0x825), region = 48  ;;  %s2518_s1 = sshll.u32 (!%p2787_p3), %s2515_s23, 3 }
  0xa8   : > { %s355_s3 = scalar_lea.sflag (!%p2787_p3), [#allocation3], %s2515_s23  ;;  %s358_s19 = scalar_lea.vmem (!%p2787_p3), [#allocation2], %s2518_s1 }
  0xae   : > { %2183 = dma.done.wait (%p2788_p0), %s355_s3, 128  }
  0xaf   : > { %2185 = vsyncadd (%p2788_p0), %s355_s3, 4294967168  ;;  %s363_s13 = sand.u32 1, %s2303_s9   ;;  %s367_s15 = scalar_lea.vmem [#allocation5], %s2518_s1 }
  0xb0   : > { %s364_s25 = scalar_lea.sflag [#allocation6], %s363_s13 }
  0xb1   : > { %2187 = dma.done.wait (%p2788_p0), %s364_s25, 256  }
  0xb2   : > { %2189 = vsyncadd (%p2788_p0), %s364_s25, 4294967040  ;;  %s376_s12 = scalar_lea.vmem [#allocation7], %s2518_s1  ;;  %p2789_p7 = scmp.eq.s32.totalorder %s2303_s9, 0 }
  0xb4   : > { %2191 = dma.done.wait (%p2789_p7), [#allocation9], 2048   ;;  %p2790_p1 = pmov %p2789_p7 }
  0xb5   : > { %v2225_v0 = vmov 0.0|0.0   ;;  %vm2226_vm0 = vmmov 0   ;;  %v2227_v1 = vmov 0.0   ;;  %v520_v2 = vld [vmem:[#allocation8 + $0x20] sm:$0xff]  ;;  %v521_v3 = vld [vmem:[#allocation8 + $0x28] sm:$0xff]  ;;  %v522_v7 = vld [vmem:[#allocation8 + $0x30] sm:$0xff] }
  0xb6   : > { %2193 = vsyncadd (%p2790_p1), [#allocation9], 4294965248  ;;  %1836 = vmatprep.subr.bf16.mxu1 %v2225_v0  ;;  %1830 = vmatprep.subr.bf16.mxu0 %v2225_v0  ;;  %v433_v4 = vld [vmem:[#allocation8] sm:$0xff]  ;;  %v1837_v5 = vpack.c.bf16 %v521_v3, %v520_v2  ;;  %v434_v6 = vld [vmem:[#allocation8 + $0x8] sm:$0xff]  ;;  %vm444_vm1 = vcmask 261120   ;;  %vm693_vm2 = vcmask 64512  }
  0xb7   : > { %1765 = vmatprep.mubr.msk.f32.mxu1 %vm2226_vm0, %v2227_v1  ;;  %1754 = vmatprep.mubr.msk.f32.mxu0 %vm2226_vm0, %v2227_v1  ;;  %v523_v8 = vld [vmem:[#allocation8 + $0x38] sm:$0xff]  ;;  %v1831_v9 = vpack.c.bf16 %v434_v6, %v433_v4  ;;  %v435_v10 = vld [vmem:[#allocation8 + $0x10] sm:$0xff]  ;;  %v518_v14 = vld [vmem:[%s367_s15] sm:$0xff]  ;;  %s2228_s21 = smov 120   ;;  %s2229_s18 = smov 112   ;;  %vm1370_vm3 = vcmask 130048  }
  0xb8   : > { %v436_v11 = vld [vmem:[#allocation8 + $0x18] sm:$0xff]  ;;  %1838 = vmatpush3.bf16.msra.mxu1 %v1837_v5  ;;  %v1840_v12 = vpack.c.bf16 %v523_v8, %v522_v7  ;;  %v1680_v16 = vld [vmem:[%s2739_s4 + $0x1] ss:$0 sm:$0xff]  ;;  %v1677_v17 = vld [vmem:[%s2739_s4] ss:$0 sm:$0xff]  ;;  %s2230_s20 = smov 104  }
  0xb9   : > { %1832 = vmatpush3.bf16.msra.mxu0 %v1831_v9  ;;  %1839 = vmatprep.subr.bf16.mxu1 %v2225_v0  ;;  %v1834_v13 = vpack.c.bf16 %v436_v11, %v435_v10  ;;  %v432_v15 = vld [vmem:[%s358_s19] sm:$0xff]  ;;  %v607_v25 = vld [vmem:[#allocation8 + $0x40] sm:$0xff]  ;;  %v608_v26 = vld [vmem:[#allocation8 + $0x48] sm:$0xff]  ;;  %s1676_s17 = sshll.u32 %s2515_s23, 5  ;;  %s2231_s3 = smov 8   ;;  %vm1372_vm4 = vcmask 195584  }
  0xba   : > { %1833 = vmatprep.subr.bf16.mxu0 %v2225_v0  ;;  %v609_v27 = vld [vmem:[#allocation8 + $0x50] sm:$0xff]  ;;  %v1843_v28 = vpack.c.bf16 %v608_v26, %v607_v25  ;;  %v610_v29 = vld [vmem:[#allocation8 + $0x58] sm:$0xff]  ;;  %s2612_s22 = scalar_lea.vmem [#allocation12], %s1676_s17  ;;  %s2232_s19 = smov 16  }
  0xbb   : > { %v1846_v30 = vpack.c.bf16 %v610_v29, %v609_v27  ;;  %v605_v31 = vld [vmem:[%s376_s12] sm:$0xff]  ;;  %v1374_v29 = vld [vmem:[#allocation10] sm:$0xff]  ;;  %s2233_s13 = smov 24   ;;  %s1491_s25 = sshll.u32 %s2612_s22, 4  ;;  %s2649_s25 = int_to_ptr.vmem [resolvable:$true] %s1491_s25 }
  0xbc   : > { %1841 = vmatpush3.bf16.msra.mxu1 %v1840_v12  ;;  %v1683_v40 = vld [vmem:[%s2739_s4 + $0x2] ss:$0 sm:$0xff]  ;;  %s1709_s15 = sshll.u32 %s2303_s9, 9  ;;  %s1465_s16 = scalar_lea.sflag [#allocation13], %s2515_s23 }
  0xbd   : > { %1835 = vmatpush3.bf16.msra.mxu0 %v1834_v13  ;;  %1779 = vmatprep.subr.mxu1 %v2227_v1  ;;  %s2655_s14 = scalar_lea.hbm %s2743_s8, %s1709_s15  ;;  %s2110_s30 = scalar_lea.vmem %s2649_s25, 512 }
  0xbe   : > { %1842 = vmatprep.subr.bf16.mxu0 %v2225_v0  ;;  %p2111_p6 = scmp.ne.s32.totalorder %s2649_s25, %s2110_s30  ;;  %p2791_p10 = scmp.ne.s32.totalorder %s2774_s24, 0 }
  0xbf   : > { %1766 = vmatmul.mubr.msk.f32.vlgmr.msra.gmra.mrb[0].mxu1 %vm444_vm1, %v518_v14 }
  0xc0   : > { %1755 = vmatmul.mubr.msk.f32.vlgmr.msra.gmra.mrb[0].mxu0 %vm444_vm1, %v432_v15  ;;  %1781 = vmatprep.mubr.msk.f32.mxu1 %vm2226_vm0, %v2227_v1  ;;  %p2112_p8 = pnand %p2111_p6, %p2791_p10 }
  0xc1   : > { %1776 = vmatprep.mubr.msk.f32.mxu0 %vm2226_vm0, %v2227_v1  ;;  %1844 = vmatpush3.bf16.msra.mxu0 %v1843_v28 }
  0xc2   : > { %1845 = vmatprep.subr.bf16.mxu0 %v2225_v0  ;;  %p2113_p9 = pneg %p2112_p8 }
  0xc5   : > { %1847 = vmatpush3.bf16.msra.mxu0 %v1846_v30  ;;  %v1375_v30 = vld [vmem:[#allocation10 + $0x8] sm:$0xff] }
  0xc6   : > { %1799 = vmatprep.subr.mxu0 %v2227_v1 }
  0xc8   : > { %1777 = vmatmul.mubr.msk.f32.vlgmr.msra.gmra.mrb[2].mxu0 %vm444_vm1, %v605_v31  ;;  %v1849_v31 = vpack.c.bf16 %v1375_v30, %v1374_v29 }
  0xc9   : > { %1801 = vmatprep.mubr.msk.f32.mxu0 %vm2226_vm0, %v2227_v1 }
 0x192   : > { %v601_v18 = vpop.f32.mrb[0].mxu1 }
 0x193   : > { %v602_v19 = vadd.f32 %v1680_v16, %v601_v18  ;;  %v514_v20 = vpop.f32.mrb[0].mxu0  ;;  %v1767_v21 = vpop.f32.mrb[1].mxu1 }
 0x194   : > { %v515_v22 = vadd.f32 %v1677_v17, %v514_v20  ;;  %v1756_v23 = vpop.f32.mrb[1].mxu0 }
 0x195   : > { %857 = vrot.lane.b32.xlu1 %v602_v19, %s2228_s21  ;;  %1780 = vmatpush3.xpose.msk.msra.mxu1 %vm693_vm2, %v602_v19 }
 0x196   : > { %v692_v24 = vmul.f32 0.35355338, %v515_v22  ;;  %1784 = vmatprep.subr.mxu1 %v2227_v1 }
 0x198   : > { %1782 = vmatmul.mubr.msk.f32.vlgmr.msra.gmra.mrb[2].mxu1 %vm693_vm2, %v692_v24 }
 0x199   : > { %855 = vrot.lane.b32.xlu1 %v692_v24, %s2228_s21  ;;  %1786 = vmatprep.mubr.msk.f32.mxu1 %vm2226_vm0, %v2227_v1 }
 0x19b   : > { %v688_v41 = vpop.f32.mrb[2].mxu0 }
 0x19c   : > { %v2585_v42 = vadd.f32 %v1683_v40, %v688_v41  ;;  %v1778_v43 = vpop.f32.mrb[3].mxu0 }
 0x19d   : > { %1023 = vrot.lane.b32.xlu1 %v692_v24, %s2229_s18 }
 0x19e   : > { %1785 = vmatpush3.msra.mxu1 %v2585_v42 }
 0x19f   : > { %1789 = vmatprep.subr.mxu1 %v2227_v1 }
 0x1a1   : > { %1192 = vrot.lane.b32.xlu1 %v602_v19, %s2230_s20 }
 0x1a5   : > { %1190 = vrot.lane.b32.xlu1 %v692_v24, %s2230_s20 }
 0x207   : > { %v858_v44 = vpop.permute.xlu1 %857 }
 0x20b   : > { %v856_v45 = vpop.permute.xlu1 %855 }
 0x20f   : > { %v1024_v46 = vpop.permute.xlu1 %1023 }
 0x213   : > { %v1193_v49 = vpop.permute.xlu1 %1192 }
 0x217   : > { %v1191_v51 = vpop.permute.xlu1 %1190 }
 0x26b   : > { %v766_v32 = vpop.f32.mrb[2].mxu1 }
 0x26c   : > { %v1783_v33 = vpop.f32.mrb[3].mxu1  ;;  %v770_v34 = vsel %vm693_vm2, %v766_v32, -inf }
 0x26d   : > { %771 = vmax.xlane.f32.xlu0 %v770_v34  ;;  %v1377_v33 = vld [vmem:[#allocation10 + $0x18] sm:$0xff] }
 0x2fa   : > { %v772_v35 = vpop.xlane.xlu0 %771 }
 0x2fb   : > { %v773_v36 = vsub.f32 %v766_v32, %v772_v35  ;;  %v1376_v32 = vld [vmem:[#allocation10 + $0x10] sm:$0xff] }
 0x2fc   : > { %v1852_v34 = vpack.c.bf16 %v1377_v33, %v1376_v32 }
 0x2fd   : > { %v774_v37 = vmul.f32 1.442695, %v773_v36 }
 0x2ff   : > { %1948 = vpow2.f32 %v774_v37 }
 0x309   : > { %v1949_v38 = vpop.eup %1948 }
 0x30a   : > { %v776_v39 = vsel %vm693_vm2, %v1949_v38, 0.0 }
 0x30b   : > { %777 = vadd.xlane.f32.xlu0 %v776_v39 }
 0x321   : > { %1025 = vrot.lane.b32.xlu0 %v602_v19, %s2229_s18 }
 0x398   : > { %v778_v47 = vpop.xlane.xlu0 %777 }
 0x399   : > { %1950 = vrcp.f32 %v778_v47 }
 0x39c   : > { %v1026_v48 = vpop.permute.xlu0 %1025 }
 0x39d   : > { %1800 = vmatpush3.xpose.msk.msra.mxu0 %vm693_vm2, %v1026_v48 }
 0x39e   : > { %1809 = vmatprep.subr.mxu0 %v2227_v1 }
 0x3a0   : > { %1802 = vmatmul.mubr.msk.f32.vlgmr.msra.gmra.mrb[4].mxu0 %vm693_vm2, %v1024_v46 }
 0x3a1   : > { %1810 = vmatpush3.xpose.msk.msra.mxu0 %vm693_vm2, %v1193_v49  ;;  %1811 = vmatprep.mubr.msk.f32.mxu0 %vm2226_vm0, %v2227_v1 }
 0x3a2   : > { %1848 = vmatprep.subr.bf16.mxu0 %v2225_v0 }
 0x3a3   : > { %v1951_v50 = vpop.eup %1950 }
 0x3a4   : > { %v780_v52 = vmul.f32 %v1951_v50, %v1949_v38  ;;  %1812 = vmatmul.mubr.msk.f32.vlgmr.msra.gmra.mrb[6].mxu0 %vm693_vm2, %v1191_v51 }
 0x3a5   : > { %1827 = vmatprep.mubr.msk.f32.mxu0 %vm2226_vm0, %v2227_v1  ;;  %1850 = vmatpush3.bf16.msra.mxu0 %v1849_v31 }
 0x3a6   : > { %1787 = vmatmul.mubr.msk.f32.vlgmr.msra.gmra.mrb[4].mxu1 %vm693_vm2, %v780_v52  ;;  %1851 = vmatprep.subr.bf16.mxu0 %v2225_v0 }
 0x3a7   : > { %1790 = vmatpush3.xpose.msk.msra.mxu1 %vm693_vm2, %v858_v44  ;;  %1791 = vmatprep.mubr.msk.f32.mxu1 %vm2226_vm0, %v2227_v1 }
 0x3a8   : > { %1794 = vmatprep.subr.mxu1 %v2227_v1 }
 0x3a9   : > { %1853 = vmatpush3.bf16.msra.mxu0 %v1852_v34 }
 0x3aa   : > { %1792 = vmatmul.mubr.msk.f32.vlgmr.msra.gmra.mrb[6].mxu1 %vm693_vm2, %v856_v45 }
 0x3ab   : > { %1796 = vmatprep.mubr.msk.f32.mxu1 %vm2226_vm0, %v2227_v1 }
 0x473   : > { %v1097_v53 = vpop.f32.mrb[4].mxu0 }
 0x474   : > { %v1803_v54 = vpop.f32.mrb[5].mxu0  ;;  %v1101_v55 = vsel %vm693_vm2, %v1097_v53, -inf }
 0x475   : > { %1102 = vmax.xlane.f32.xlu0 %v1101_v55 }
 0x477   : > { %v1264_v56 = vpop.f32.mrb[6].mxu0 }
 0x478   : > { %v1813_v57 = vpop.f32.mrb[7].mxu0  ;;  %v1268_v63 = vsel %vm693_vm2, %v1264_v56, -inf }
 0x479   : > { %v2610_v58 = vpop.f32.mrb[4].mxu1 }
 0x47a   : > { %854 = vst.msk [vmem:[%s2612_s22] sm:$0xff] %vm693_vm2, %v2610_v58  ;;  %v1788_v59 = vpop.f32.mrb[5].mxu1 }
 0x47d   : > { %v929_v60 = vpop.f32.mrb[6].mxu1 }
 0x47e   : > { %v1793_v61 = vpop.f32.mrb[7].mxu1  ;;  %v933_v62 = vsel %vm693_vm2, %v929_v60, -inf }
 0x47f   : > { %934 = vmax.xlane.f32.xlu1 %v933_v62 }
 0x483   : > { %1269 = vmax.xlane.f32.xlu1 %v1268_v63 }
 0x502   : > { %v1103_v2 = vpop.xlane.xlu0 %1102 }
 0x503   : > { %v1104_v3 = vsub.f32 %v1097_v53, %v1103_v2 }
 0x505   : > { %v1105_v4 = vmul.f32 1.442695, %v1104_v3 }
 0x507   : > { %1952 = vpow2.f32 %v1105_v4 }
 0x50c   : > { %v935_v5 = vpop.xlane.xlu1 %934 }
 0x50d   : > { %v936_v13 = vsub.f32 %v929_v60, %v935_v5 }
 0x50f   : > { %v937_v14 = vmul.f32 1.442695, %v936_v13 }
 0x510   : > { %v1270_v6 = vpop.xlane.xlu1 %1269 }
 0x511   : > { %v1953_v7 = vpop.eup %1952  ;;  %v1271_v8 = vsub.f32 %v1264_v56, %v1270_v6 }
 0x512   : > { %v1107_v9 = vsel %vm693_vm2, %v1953_v7, 0.0 }
 0x513   : > { %v1272_v10 = vmul.f32 1.442695, %v1271_v8  ;;  %1108 = vadd.xlane.f32.xlu0 %v1107_v9 }
 0x515   : > { %1954 = vpow2.f32 %v1272_v10 }
 0x516   : > { %1956 = vpow2.f32 %v937_v14 }
 0x51f   : > { %v1955_v11 = vpop.eup %1954 }
 0x520   : > { %v1274_v12 = vsel %vm693_vm2, %v1955_v11, 0.0  ;;  %v1957_v15 = vpop.eup %1956 }
 0x521   : > { %1275 = vadd.xlane.f32.xlu1 %v1274_v12  ;;  %v939_v16 = vsel %vm693_vm2, %v1957_v15, 0.0 }
 0x529   : > { %945 = vrot.lane.b32.xlu0 %v2585_v42, %s2228_s21  ;;  %s2234_s21 = smov [#allocation12]  }
 0x532   : > { %1112 = vrot.lane.b32.xlu1 %v2585_v42, %s2229_s18  ;;  %s2114_s18 = sshll.u32 %s2234_s21, 4  ;;  %s2115_s18 = int_to_ptr.vmem [resolvable:$false] %s2114_s18 }
 0x533   : > { %p2117_p11 = scmp.lt.s32.totalorder %s2649_s25, %s2115_s18 }
 0x556   : > { %940 = vadd.xlane.f32.xlu1 %v939_v16 }
 0x567   : > { %1279 = vrot.lane.b32.xlu1 %v2585_v42, %s2230_s20  ;;  %s2116_s20 = scalar_lea.vmem %s2115_s18, 1024 }
 0x568   : > { %p2118_p4 = scmp.lt.s32.totalorder %s2116_s20, %s2110_s30 }
 0x56a   : > { %p2119_p13 = por %p2118_p4, %p2117_p11 }
 0x56c   : > { %p2120_p2 = pnand %p2119_p13, %p2113_p9 }
 0x5a0   : > { %v1109_v17 = vpop.xlane.xlu0 %1108 }
 0x5a4   : > { %v946_v18 = vpop.permute.xlu0 %945 }
 0x5a5   : > { %1795 = vmatpush3.msra.mxu1 %v946_v18 }
 0x5a6   : > { %1804 = vmatprep.subr.mxu1 %v2227_v1 }
 0x5ae   : > { %v1276_v19 = vpop.xlane.xlu1 %1275 }
 0x5b2   : > { %v1113_v20 = vpop.permute.xlu1 %1112 }
 0x5e3   : > { %v941_v21 = vpop.xlane.xlu1 %940 }
 0x5e4   : > { %1958 = vrcp.f32 %v941_v21 }
 0x5e5   : > { %1960 = vrcp.f32 %v1109_v17 }
 0x5e6   : > { %1962 = vrcp.f32 %v1276_v19 }
 0x5e7   : > { %v1280_v27 = vpop.permute.xlu1 %1279 }
 0x5ee   : > { %v1959_v22 = vpop.eup %1958 }
 0x5ef   : > { %v943_v23 = vmul.f32 %v1959_v22, %v1957_v15  ;;  %v1961_v24 = vpop.eup %1960 }
 0x5f0   : > { %v1111_v25 = vmul.f32 %v1961_v24, %v1953_v7  ;;  %v1963_v26 = vpop.eup %1962 }
 0x5f1   : > { %1797 = vmatmul.mubr.msk.f32.vlgmr.msra.gmra.mrb[8].mxu1 %vm693_vm2, %v943_v23  ;;  %v1278_v28 = vmul.f32 %v1963_v26, %v1955_v11 }
 0x5f2   : > { %1805 = vmatpush3.msra.mxu1 %v1113_v20  ;;  %1806 = vmatprep.mubr.msk.f32.mxu1 %vm2226_vm0, %v2227_v1 }
 0x5f3   : > { %1814 = vmatprep.subr.mxu1 %v2227_v1 }
 0x5f5   : > { %1807 = vmatmul.mubr.msk.f32.vlgmr.msra.gmra.mrb[10].mxu1 %vm693_vm2, %v1111_v25 }
 0x5f6   : > { %1815 = vmatpush3.msra.mxu1 %v1280_v27  ;;  %1816 = vmatprep.mubr.msk.f32.mxu1 %vm2226_vm0, %v2227_v1 }
 0x5f9   : > { %1817 = vmatmul.mubr.msk.f32.vlgmr.msra.gmra.mrb[12].mxu1 %vm693_vm2, %v1278_v28 }
 0x6c4   : > { %v1017_v35 = vpop.f32.mrb[8].mxu1 }
 0x6c5   : > { %1691 = vst.msk [vmem:[%s2612_s22 + $0x8] sm:$0xff] %vm693_vm2, %v1017_v35  ;;  %1358 = vrot.lane.b32.xlu0 %v1017_v35, %s2231_s3  ;;  %v1798_v1 = vpop.f32.mrb[9].mxu1 }
 0x6c8   : > { %v1184_v36 = vpop.f32.mrb[10].mxu1 }
 0x6c9   : > { %1695 = vst.msk [vmem:[%s2612_s22 + $0x10] sm:$0xff] %vm693_vm2, %v1184_v36  ;;  %1362 = vrot.lane.b32.xlu1 %v1184_v36, %s2232_s19  ;;  %v1808_v37 = vpop.f32.mrb[11].mxu1 }
 0x6cc   : > { %v1351_v0 = vpop.f32.mrb[12].mxu1 }
 0x6cd   : > { %1699 = vst.msk [vmem:[%s2612_s22 + $0x18] sm:$0xff] %vm693_vm2, %v1351_v0  ;;  %1366 = vrot.lane.b32.xlu0 %v1351_v0, %s2233_s13  ;;  %v1818_v38 = vpop.f32.mrb[13].mxu1 }
 0x737   : > { %v1359_v39 = vpop.permute.xlu0 %1358 }
 0x738   : > { %v1369_v41 = vsel %vm693_vm2, %v2610_v58, %v1359_v39 }
 0x73b   : > { %v1363_v40 = vpop.permute.xlu1 %1362 }
 0x73c   : > { %v1371_v42 = vsel %vm1370_vm3, %v1369_v41, %v1363_v40 }
 0x73f   : > { %v1367_v43 = vpop.permute.xlu0 %1366 }
 0x740   : > { %v1373_v44 = vsel %vm1372_vm4, %v1371_v42, %v1367_v43 }
 0x741   : > { %1828 = vmatmul.mubr.msk.f32.vlgmr.msra.gmra.mrb[8].mxu0 %vm444_vm1, %v1373_v44 }
 0x742   : > { %2123 = shalt.err (!%p2120_p2)
}
 0x743   : > { %s2124_s26 = scalar_lea.hbm %s2655_s14, 512  ;;  %s2128_s22 = scalar_lea.hbm %s2743_s8, 1024 }
 0x744   : > { %p2125_p5 = scmp.ne.s32.totalorder %s2655_s14, %s2124_s26  ;;  %p2129_p0 = scmp.lt.u32.totalorder %s2655_s14, %s2743_s8 }
 0x745   : > { %p2130_p7 = scmp.lt.u32.totalorder %s2128_s22, %s2124_s26  ;;  %p2132_p6 = scmp.lt.u32.totalorder %s2124_s26, %s2655_s14 }
 0x746   : > { %p2126_p12 = pnand %p2125_p5, %p2791_p10 }
 0x747   : > { %p2131_p1 = por %p2130_p7, %p2129_p0 }
 0x748   : > { %p2127_p3 = pneg %p2126_p12 }
 0x749   : > { %p2133_p8 = por %p2132_p6, %p2131_p1 }
 0x74b   : > { %p2134_p9 = pnand %p2133_p8, %p2127_p3 }
 0x74d   : > { %2137 = shalt.err (!%p2134_p9)
}
 0x74e   : > { %s2235_s15 = smov 128   ;;  %v1700_v45 = vld [vmem:[%s2741_s6] ss:$0 sm:$0xff]  ;;  %s1704_s30 = sshll.u32 %s2303_s9, 7 }
 0x74f   : > { %1869 = dma.vmem_to_hbm [thread:$0]  (%p2791_p10), %s2649_s25, 512, %s2655_s14, %s1465_s16, %s2235_s15, %s2235_s15, %s2231_s3  }
 0x750   : > { %s424_s21 = scalar_lea.vmem [#allocation11], %s2518_s1  ;;  %s2690_s10 = scalar_lea.hbm %s2742_s7, %s1704_s30 }
 0x751   : > { %s1478_s18 = sshll.u32 %s424_s21, 4  ;;  %s1460_s3 = scalar_lea.sflag [#allocation4], %s2515_s23  ;;  %s2692_s18 = int_to_ptr.vmem [resolvable:$true] %s1478_s18 }
 0x752   : > { %s2138_s25 = scalar_lea.vmem %s2692_s18, 128  ;;  %s2236_s9 = smov [#allocation11]  }
 0x753   : > { %p2139_p11 = scmp.ne.s32.totalorder %s2692_s18, %s2138_s25  ;;  %s2142_s1 = sshll.u32 %s2236_s9, 4  ;;  %s2143_s1 = int_to_ptr.vmem [resolvable:$false] %s2142_s1 }
 0x754   : > { %s2144_s14 = scalar_lea.vmem %s2143_s1, 256  ;;  %p2145_p2 = scmp.lt.s32.totalorder %s2692_s18, %s2143_s1 }
 0x755   : > { %p2140_p4 = pnand %p2139_p11, %p2791_p10  ;;  %p2146_p5 = scmp.lt.s32.totalorder %s2144_s14, %s2138_s25 }
 0x757   : > { %p2141_p13 = pneg %p2140_p4  ;;  %p2147_p12 = por %p2146_p5, %p2145_p2 }
 0x759   : > { %p2148_p3 = pnand %p2147_p12, %p2141_p13 }
 0x814   : > { %v1454_v46 = vpop.f32.mrb[8].mxu0 }
 0x815   : > { %v1455_v47 = vadd.f32 %v1700_v45, %v1454_v46  ;;  %v1829_v48 = vpop.f32.mrb[9].mxu0 }
 0x817   : > { %1458 = vst.msk [vmem:[%s424_s21] sm:$0xff] %vm444_vm1, %v1455_v47 }
 0x818   : > { %2151 = shalt.err (!%p2148_p3)
}
 0x819   : > { %s2152_s23 = scalar_lea.hbm %s2690_s10, 128  ;;  %s2156_s22 = scalar_lea.hbm %s2742_s7, 256 }
 0x81a   : > { %p2153_p0 = scmp.ne.s32.totalorder %s2690_s10, %s2152_s23  ;;  %p2157_p6 = scmp.lt.u32.totalorder %s2690_s10, %s2742_s7 }
 0x81b   : > { %p2158_p8 = scmp.lt.u32.totalorder %s2156_s22, %s2152_s23  ;;  %p2160_p11 = scmp.lt.u32.totalorder %s2152_s23, %s2690_s10 }
 0x81c   : > { %p2154_p7 = pnand %p2153_p0, %p2791_p10 }
 0x81d   : > { %p2159_p9 = por %p2158_p8, %p2157_p6 }
 0x81e   : > { %p2155_p1 = pneg %p2154_p7 }
 0x81f   : > { %p2161_p4 = por %p2160_p11, %p2159_p9 }
 0x821   : > { %p2162_p13 = pnand %p2161_p4, %p2155_p1 }
 0x823   : > { %2165 = shalt.err (!%p2162_p13)
}
 0x824   : > { %1868 = dma.vmem_to_hbm [thread:$0]  (%p2791_p10), %s2692_s18, 128, %s2690_s10, %s1460_s3  }
 0x825 PF: > { %s2792_s15 = sld [smem:[#allocation20_spill]]  ;;  %s2793_s12 = sld [smem:[#allocation19_spill]] }
 0x826   : > { %s1506_s11 = sand.u32 1, %s2204_s27  }
 0x827   : > { %s1507_s30 = scalar_lea.sflag [#allocation4], %s1506_s11 }
 0x82b   : > { %p2794_p2 = scmp.ne.s32.totalorder %s2792_s15, 0  ;;  %p2795_p5 = scmp.ge.s32.totalorder %s2793_s12, 2 }
 0x82d   : > { %p1890_p12 = pnand %p2795_p5, %p2794_p2 }
 0x82f   : > { %2195 = dma.done.wait (!%p1890_p12), %s1507_s30, 128  }
 0x830   : > { %2197 = vsyncadd (!%p1890_p12), %s1507_s30, 4294967168  ;;  %s1516_s21 = scalar_lea.sflag [#allocation13], %s1506_s11 }
 0x831   : > { %2199 = dma.done.wait (!%p1890_p12), %s1516_s21, 512  }
 0x832   : > { %2201 = vsyncadd (!%p1890_p12), %s1516_s21, 4294966784  ;;  %s2796_s30 = sld [smem:[#allocation21_spill]]  ;;  %s2797_s24 = sld [smem:[#allocation22_spill]] }
 0x833   : > { %s2798_s27 = smov %s2208_s28  ;;  %s2799_s28 = smov %s2212_s29 }
 0x838   : > { %p29_p10 = scmp.ge.s32.totalorder %s2796_s30, 4   ;;  %s2800_s29 = smov %s2797_s24 }
 0x83a   :  { %31 = sbr.rel (!%p29_p10) target bundleno = 13 (0xd), region = 149 }
 0x841   :  { %1521 = vsyncpa [#allocation3], 1 }
 0x842   :  { %1523 = vsyncpa [#allocation3 + $0x1], 1 }
 0x843   :  { %1524 = vsyncpa [#allocation6], 1 }
 0x844   :  { %1526 = vsyncpa [#allocation6 + $0x1], 1 }
 0x845   :  { %1527 = vsyncpa [#allocation9], 1 }
 0x846   :  { %1528 = vsyncpa [#allocation4], 1 }
 0x847   :  { %1530 = vsyncpa [#allocation4 + $0x1], 1 }
 0x848   :  { %1531 = vsyncpa [#allocation13], 1 }
 0x849   :  { %1533 = vsyncpa [#allocation13 + $0x1], 1 }

</bundles_post_ra>
